<compile_context>
chip_gen: v7x
topology: tpu7x:2x2x1
jax: 0.10.0
libtpu: 0.0.40
codegen_flags: <defaults>
</compile_context>

<pallas_src>
import jax
import jax.numpy as jnp
from jax.experimental import pallas as pl
from jax.experimental.pallas import tpu as pltpu


def _round_up(x, m):
    return (x + m - 1) // m * m


# ---------------------------------------------------------------------------
# Kernel 1:  H1 = relu((Ahat @ X) @ W1 + b1)
# Grid (row_tiles, col_tiles); accumulates Ahat @ X in an f32 scratch, applies
# W1 / bias / ReLU once per row tile on the last reduction step.
# ---------------------------------------------------------------------------
def conv1_kernel(a_ref, x_ref, w1_ref, b1_ref, h_ref, acc_ref):
    k = pl.program_id(1)

    @pl.when(k == 0)
    def _():
        acc_ref[...] = jnp.zeros_like(acc_ref)

    # bf16 MXU matmul, f32 accumulation.
    acc_ref[...] += jnp.dot(a_ref[...], x_ref[...],
                            preferred_element_type=jnp.float32)

    @pl.when(k == pl.num_programs(1) - 1)
    def _():
        ax = acc_ref[...].astype(jnp.bfloat16)
        h = jnp.dot(ax, w1_ref[...], preferred_element_type=jnp.float32)
        h = jnp.maximum(h + b1_ref[...], 0.0)
        h_ref[...] = h.astype(h_ref.dtype)


# ---------------------------------------------------------------------------
# Kernel 2:  out = (((P @ Ahat) @ H1) @ W2 + b2) @ Wlin + blin
# Mean pooling folded into the propagation (PA = P @ Ahat, rows of P sum to 1,
# so the bias term is unchanged).  Dropout(p=0.5, training=False) == identity.
# ---------------------------------------------------------------------------
def conv2_pool_lin_kernel(pa_ref, h_ref, w2_ref, b2_ref, wl_ref, bl_ref,
                          out_ref, acc_ref):
    k = pl.program_id(0)

    @pl.when(k == 0)
    def _():
        acc_ref[...] = jnp.zeros_like(acc_ref)

    acc_ref[...] += jnp.dot(pa_ref[...], h_ref[...],
                            preferred_element_type=jnp.float32)

    @pl.when(k == pl.num_programs(0) - 1)
    def _():
        g = jnp.dot(acc_ref[...].astype(jnp.bfloat16), w2_ref[...],
                    preferred_element_type=jnp.float32) + b2_ref[...]
        # TODO(synk): training-mode dropout (pltpu.prng_random_bits mask) not emitted.
        out_ref[...] = (jnp.dot(g.astype(jnp.bfloat16), wl_ref[...],
                                preferred_element_type=jnp.float32)
                        + bl_ref[...]).astype(out_ref.dtype)


def gcn_forward(ahat, x, w1, b1, w2, b2, pool, wlin, blin, *, tile=128):
    """GCN forward.  `tile` = node-dimension tile (multiple of 128).
    Suggested: 512-1024 on v6e (128 MiB VMEM), ~256 on v7x (64 MiB VMEM),
    128/256 on v5e."""
    N, F = x.shape
    H = w1.shape[1]
    G = pool.shape[0]
    C = wlin.shape[1]

    Np = _round_up(N, tile)
    Fp = _round_up(F, 128)
    Hp = _round_up(H, 128)
    Cp = _round_up(C, 128)
    Gp = _round_up(G, 8)

    f32 = jnp.float32
    bf16 = jnp.bfloat16

    # Zero-pad to hardware-friendly (lane-dense) shapes.
    ahat_p = jnp.zeros((Np, Np), f32).at[:N, :N].set(ahat)
    x_p = jnp.zeros((Np, Fp), f32).at[:N, :F].set(x)
    w1_p = jnp.zeros((Fp, Hp), f32).at[:F, :H].set(w1)
    b1_p = jnp.zeros((1, Hp), f32).at[:, :H].set(b1)
    w2_p = jnp.zeros((Hp, Hp), f32).at[:H, :H].set(w2)
    b2_p = jnp.zeros((1, Hp), f32).at[:, :H].set(b2)
    wl_p = jnp.zeros((Hp, Cp), f32).at[:H, :C].set(wlin)
    bl_p = jnp.zeros((1, Cp), f32).at[:, :C].set(blin)
    pool_p = jnp.zeros((Gp, Np), f32).at[:G, :N].set(pool)

    # Fold mean pooling into the second propagation (glue; O(G*N^2) only).
    pa_p = pool_p @ ahat_p

    # bf16 MXU inputs; f32 accumulation happens inside the kernels.
    a_bf = ahat_p.astype(bf16)
    x_bf = x_p.astype(bf16)
    w1_bf = w1_p.astype(bf16)
    w2_bf = w2_p.astype(bf16)
    wl_bf = wl_p.astype(bf16)
    pa_bf = pa_p.astype(bf16)

    vmem_limit = 64 * 1024 * 1024

    # ---- kernel 1: H1 = relu(Ahat @ X @ W1 + b1) --------------------------
    grid1 = (Np // tile, Np // tile)
    cost1 = pl.CostEstimate(
        flops=2 * Np * Np * Fp + 2 * Np * Fp * Hp,
        transcendentals=0,
        bytes_accessed=2 * Np * Np + 2 * Np * Fp + 2 * Fp * Hp
        + 4 * Hp + 2 * Np * Hp)
    h1 = pl.pallas_call(
        conv1_kernel,
        out_shape=jax.ShapeDtypeStruct((Np, Hp), bf16),
        grid_spec=pltpu.PrefetchScalarGridSpec(
            num_scalar_prefetch=0,
            grid=grid1,
            in_specs=[
                pl.BlockSpec((tile, tile), lambda i, k: (i, k)),   # Ahat tile
                pl.BlockSpec((tile, Fp), lambda i, k: (k, 0)),     # X tile
                pl.BlockSpec((Fp, Hp), lambda i, k: (0, 0)),       # W1 resident
                pl.BlockSpec((1, Hp), lambda i, k: (0, 0)),        # b1 resident
            ],
            out_specs=pl.BlockSpec((tile, Hp), lambda i, k: (i, 0)),
            scratch_shapes=[pltpu.VMEM((tile, Fp), f32)],
        ),
        compiler_params=pltpu.CompilerParams(
            dimension_semantics=("parallel", "arbitrary"),
            vmem_limit_bytes=vmem_limit),
        cost_estimate=cost1,
    )(a_bf, x_bf, w1_bf, b1_p)

    # ---- kernel 2: out = ((PA @ H1) @ W2 + b2) @ Wlin + blin --------------
    grid2 = (Np // tile,)
    cost2 = pl.CostEstimate(
        flops=2 * Gp * Np * Hp + 2 * Gp * Hp * Hp + 2 * Gp * Hp * Cp,
        transcendentals=0,
        bytes_accessed=2 * Gp * Np + 2 * Np * Hp + 2 * Hp * Hp
        + 2 * Hp * Cp + 4 * Gp * Cp)
    out_p = pl.pallas_call(
        conv2_pool_lin_kernel,
        out_shape=jax.ShapeDtypeStruct((Gp, Cp), f32),
        grid_spec=pltpu.PrefetchScalarGridSpec(
            num_scalar_prefetch=0,
            grid=grid2,
            in_specs=[
                pl.BlockSpec((Gp, tile), lambda k: (0, k)),   # PA tile
                pl.BlockSpec((tile, Hp), lambda k: (k, 0)),   # H1 tile
                pl.BlockSpec((Hp, Hp), lambda k: (0, 0)),     # W2 resident
                pl.BlockSpec((1, Hp), lambda k: (0, 0)),      # b2 resident
                pl.BlockSpec((Hp, Cp), lambda k: (0, 0)),     # Wlin resident
                pl.BlockSpec((1, Cp), lambda k: (0, 0)),      # blin resident
            ],
            out_specs=pl.BlockSpec((Gp, Cp), lambda k: (0, 0)),
            scratch_shapes=[pltpu.VMEM((Gp, Hp), f32)],
        ),
        compiler_params=pltpu.CompilerParams(
            dimension_semantics=("arbitrary",),
            vmem_limit_bytes=vmem_limit),
        cost_estimate=cost2,
    )(pa_bf, h1, w2_bf, b2_p, wl_bf, bl_p)

    return out_p[:G, :C]


def build_normalized_adjacency(edge_index, num_nodes):
    """Dense Ahat = D^{-1/2} (A + I) D^{-1/2} (PyG GCNConv default norm).
    Duplicate edges accumulate (matches PyG message summation)."""
    src, dst = edge_index[0], edge_index[1]
    adj = jnp.zeros((num_nodes, num_nodes), jnp.float32)
    adj = adj.at[dst, src].add(1.0)                       # message src -> dst
    adj = adj + jnp.eye(num_nodes, dtype=jnp.float32)     # self loops
    deg = adj.sum(axis=1)
    dinv = jnp.where(deg > 0, 1.0 / jnp.sqrt(deg), 0.0)
    return dinv[:, None] * adj * dinv[None, :]


def build_mean_pool_matrix(batch, num_graphs):
    """P[g, n] = 1/|graph g| if batch[n] == g else 0."""
    onehot = (batch[None, :] == jnp.arange(num_graphs)[:, None]).astype(jnp.float32)
    counts = onehot.sum(axis=1, keepdims=True)
    return onehot / jnp.maximum(counts, 1.0)


if __name__ == "__main__":
    # Small synthetic graph batch: 2 graphs of 8 nodes each (16 nodes total),
    # 4 node features, hidden_channels=32, 3 classes.
    N, F, H, G, C = 16, 4, 32, 2, 3

    # Two ring graphs (nodes 0..7 and 8..15), undirected (both directions).
    ring0 = [(i, (i + 1) % 8) for i in range(8)]
    ring1 = [(8 + i, 8 + (i + 1) % 8) for i in range(8)]
    edges = ring0 + ring1
    edges = edges + [(b, a) for (a, b) in edges]
    edge_index = jnp.array(edges, dtype=jnp.int32).T          # [2, 32]
    batch = jnp.array([0] * 8 + [1] * 8, dtype=jnp.int32)     # [16]

    key = jax.random.PRNGKey(0)
    kx, k1, k2, k3 = jax.random.split(key, 4)
    x = jax.random.normal(kx, (N, F), jnp.float32)

    # Deterministic parameter init (synthetic; no checkpoint load).
    w1 = jax.random.normal(k1, (F, H), jnp.float32) * (1.0 / jnp.sqrt(F))
    b1 = jnp.zeros((1, H), jnp.float32)
    w2 = jax.random.normal(k2, (H, H), jnp.float32) * (1.0 / jnp.sqrt(H))
    b2 = jnp.zeros((1, H), jnp.float32)
    wlin = jax.random.normal(k3, (H, C), jnp.float32) * (1.0 / jnp.sqrt(H))
    blin = jnp.zeros((1, C), jnp.float32)

    ahat = build_normalized_adjacency(edge_index, N)           # [N, N]
    pool = build_mean_pool_matrix(batch, G)                    # [G, N]

    out = gcn_forward(ahat, x, w1, b1, w2, b2, pool, wlin, blin)
    out = jax.block_until_ready(out)

    # Pure-JAX reference (f32 math with the bf16-rounded operands the kernel
    # sees; kernels use bf16 MXU inputs with f32 accumulation).
    def q(a):
        return a.astype(jnp.bfloat16).astype(jnp.float32)

    ref_h = jnp.maximum(q(ahat) @ (q(x) @ q(w1)) + b1, 0.0)
    ref_h = q(ahat) @ (ref_h @ q(w2)) + b2
    ref = (pool @ ref_h) @ q(wlin) + blin

    assert out.shape == (G, C)
    assert jnp.allclose(out, ref, atol=5e-2, rtol=5e-2), (out, ref)

    print("KERNEL_OK")
</pallas_src>

<mosaic_0001>
module attributes {stable_mosaic.version = 11 : i64} {
  func.func @conv1_kernel(%arg0: i32, %arg1: i32, %arg2: memref<128x128xbf16, #tpu.memory_space<vmem>>, %arg3: memref<128x128xbf16, #tpu.memory_space<vmem>>, %arg4: memref<128x128xbf16, #tpu.memory_space<vmem>>, %arg5: memref<1x128xf32, #tpu.memory_space<vmem>>, %arg6: memref<128x128xbf16, #tpu.memory_space<vmem>>, %arg7: memref<128x128xf32, #tpu.memory_space<vmem>>) attributes {dimension_semantics = [#tpu.dimension_semantics<parallel>, #tpu.dimension_semantics<arbitrary>], iteration_bounds = array<i64: 1, 1>, scalar_prefetch = 0 : i64, scratch_operands = 1 : i64, tpu.core_type = #tpu.core_type<tc>, window_params = [{transform_indices = @transform_0, window_bounds = array<i64: 128, 128>}, {transform_indices = @transform_1, window_bounds = array<i64: 128, 128>}, {pipeline_mode = #tpu.pipeline_mode<synchronous>, transform_indices = @transform_2, window_bounds = array<i64: 128, 128>}, {pipeline_mode = #tpu.pipeline_mode<synchronous>, transform_indices = @transform_3, window_bounds = array<i64: 1, 128>}, {transform_indices = @transform_4, window_bounds = array<i64: 128, 128>}]} {
    %c0_i32 = arith.constant 0 : i32
    %0 = arith.cmpi eq, %arg1, %c0_i32 : i32
    %1 = arith.extui %0 : i1 to i32
    %c0_i32_0 = arith.constant 0 : i32
    %2 = arith.cmpi ne, %1, %c0_i32_0 : i32
    scf.if %2 {
      %cst_10 = arith.constant 0.000000e+00 : f32
      %12 = vector.broadcast %cst_10 : f32 to vector<128x128xf32>
      %c0_11 = arith.constant 0 : index
      %c0_12 = arith.constant 0 : index
      %13 = vector.load %arg7[%c0_11, %c0_12] : memref<128x128xf32, #tpu.memory_space<vmem>>, vector<128x128xf32>
      tpu.vector_store %arg7[%c0_11, %c0_12], %12 {strides = array<i32>} : memref<128x128xf32, #tpu.memory_space<vmem>>, vector<128x128xf32>,
    } else {
    }
    %c0 = arith.constant 0 : index
    %c0_1 = arith.constant 0 : index
    %3 = vector.load %arg7[%c0, %c0_1] : memref<128x128xf32, #tpu.memory_space<vmem>>, vector<128x128xf32>
    %c0_2 = arith.constant 0 : index
    %c0_3 = arith.constant 0 : index
    %4 = vector.load %arg2[%c0_2, %c0_3] : memref<128x128xbf16, #tpu.memory_space<vmem>>, vector<128x128xbf16>
    %c0_4 = arith.constant 0 : index
    %c0_5 = arith.constant 0 : index
    %5 = vector.load %arg3[%c0_4, %c0_5] : memref<128x128xbf16, #tpu.memory_space<vmem>>, vector<128x128xbf16>
    %cst = arith.constant dense<0.000000e+00> : vector<128x128xf32>
    %6 = tpu.matmul %4, %5, %cst {dimension_numbers = #tpu.dot_dimension_numbers<[1], [0], [0], [1], [0, 0, 1, 1], [], []>} : vector<128x128xbf16>, vector<128x128xbf16>, vector<128x128xf32> -> vector<128x128xf32>
    %7 = arith.addf %3, %6 : vector<128x128xf32>
    %c0_6 = arith.constant 0 : index
    %c0_7 = arith.constant 0 : index
    %8 = vector.load %arg7[%c0_6, %c0_7] : memref<128x128xf32, #tpu.memory_space<vmem>>, vector<128x128xf32>
    tpu.vector_store %arg7[%c0_6, %c0_7], %7 {strides = array<i32>} : memref<128x128xf32, #tpu.memory_space<vmem>>, vector<128x128xf32>,
    %c0_i32_8 = arith.constant 0 : i32
    %9 = arith.cmpi eq, %arg1, %c0_i32_8 : i32
    %10 = arith.extui %9 : i1 to i32
    %c0_i32_9 = arith.constant 0 : i32
    %11 = arith.cmpi ne, %10, %c0_i32_9 : i32
    scf.if %11 {
      %c0_10 = arith.constant 0 : index
      %c0_11 = arith.constant 0 : index
      %12 = vector.load %arg7[%c0_10, %c0_11] : memref<128x128xf32, #tpu.memory_space<vmem>>, vector<128x128xf32>
      %13 = arith.truncf %12 : vector<128x128xf32> to vector<128x128xbf16>
      %c0_12 = arith.constant 0 : index
      %c0_13 = arith.constant 0 : index
      %14 = vector.load %arg4[%c0_12, %c0_13] : memref<128x128xbf16, #tpu.memory_space<vmem>>, vector<128x128xbf16>
      %cst_14 = arith.constant dense<0.000000e+00> : vector<128x128xf32>
      %15 = tpu.matmul %13, %14, %cst_14 {dimension_numbers = #tpu.dot_dimension_numbers<[1], [0], [0], [1], [0, 0, 1, 1], [], []>} : vector<128x128xbf16>, vector<128x128xbf16>, vector<128x128xf32> -> vector<128x128xf32>
      %c0_15 = arith.constant 0 : index
      %c0_16 = arith.constant 0 : index
      %16 = vector.load %arg5[%c0_15, %c0_16] : memref<1x128xf32, #tpu.memory_space<vmem>>, vector<1x128xf32>
      %17 = vector.broadcast %16 : vector<1x128xf32> to vector<128x128xf32>
      %18 = arith.addf %15, %17 : vector<128x128xf32>
      %cst_17 = arith.constant 0.000000e+00 : f32
      %19 = vector.broadcast %cst_17 : f32 to vector<128x128xf32>
      %20 = arith.maximumf %18, %19 : vector<128x128xf32>
      %21 = arith.truncf %20 : vector<128x128xf32> to vector<128x128xbf16>
      %c0_18 = arith.constant 0 : index
      %c0_19 = arith.constant 0 : index
      %22 = vector.load %arg6[%c0_18, %c0_19] : memref<128x128xbf16, #tpu.memory_space<vmem>>, vector<128x128xbf16>
      tpu.vector_store %arg6[%c0_18, %c0_19], %21 {strides = array<i32>} : memref<128x128xbf16, #tpu.memory_space<vmem>>, vector<128x128xbf16>,
    } else {
    }
    return
  }
  func.func @transform_0(%arg0: i32, %arg1: i32) -> (i32, i32) {
    %c0_i32 = arith.constant 0 : i32
    return %arg0, %arg1 : i32, i32
  }
  func.func @transform_1(%arg0: i32, %arg1: i32) -> (i32, i32) {
    %c0_i32 = arith.constant 0 : i32
    %c0_i32_0 = arith.constant 0 : i32
    return %arg1, %c0_i32 : i32, i32
  }
  func.func @transform_2(%arg0: i32, %arg1: i32) -> (i32, i32) {
    %c0_i32 = arith.constant 0 : i32
    %c0_i32_0 = arith.constant 0 : i32
    %c0_i32_1 = arith.constant 0 : i32
    return %c0_i32, %c0_i32_0 : i32, i32
  }
  func.func @transform_3(%arg0: i32, %arg1: i32) -> (i32, i32) {
    %c0_i32 = arith.constant 0 : i32
    %c0_i32_0 = arith.constant 0 : i32
    %c0_i32_1 = arith.constant 0 : i32
    return %c0_i32, %c0_i32_0 : i32, i32
  }
  func.func @transform_4(%arg0: i32, %arg1: i32) -> (i32, i32) {
    %c0_i32 = arith.constant 0 : i32
    %c0_i32_0 = arith.constant 0 : i32
    return %arg0, %c0_i32 : i32, i32
  }
}

</mosaic_0001>

<bundles_post_ra>
// kernel: tpu_custom_call.1
= control target key start
LH: loop header
LB: loop body
LE: loop exit
PB: predicated region body
PF: predicated region fallthrough
CT: control target
= control target key end

     0   :  { %9 = vsyncpa [#allocation4], 0  ;;  %s1135_s0 = inlined_call_operand.hbm [shape: bf16[128,128], index: 0, kind: input, shape index: {}]   ;;  %s1136_s1 = inlined_call_operand.hbm [shape: bf16[128,128], index: 1, kind: input, shape index: {}]   ;;  %s1137_s2 = inlined_call_operand.hbm [shape: bf16[128,128], index: 2, kind: input, shape index: {}]   ;;  %s1138_s3 = inlined_call_operand.hbm [shape: f32[1,128], index: 3, kind: input, shape index: {}]   ;;  %s1139_s4 = inlined_call_operand.hbm [shape: bf16[128,128], index: 4, kind: output, shape index: {}]  }
   0x1   :  { %10 = vsyncpa [#allocation7], 0 }
   0x2   :  { %11 = vsyncpa [#allocation10], 0 }
   0x3   :  { %12 = vsyncpa [#allocation5], 0  ;;  %s1024_s15 = smov [#allocation6]   ;;  %s1025_s17 = smov [#allocation3]  }
   0x4   :  { %s30_s16 = sshll.u32 %s1024_s15, 4  ;;  %s18_s18 = sshll.u32 %s1025_s17, 4  ;;  %s31_s16 = int_to_ptr.vmem [resolvable:$true] %s30_s16  ;;  %s1056_s18 = int_to_ptr.vmem [resolvable:$true] %s18_s18 }
   0x5   :  { %s906_s21 = scalar_lea.hbm %s1136_s1, 1024 }
   0x6   :  { %p907_p0 = scmp.ne.s32.totalorder %s1136_s1, %s906_s21  ;;  %p910_p1 = scmp.lt.u32.totalorder %s906_s21, %s1136_s1 }
   0x8   :  { %p912_p2 = pnand %p910_p1, %p907_p0 }
   0xa   :  { %915 = shalt.err (!%p912_p2)
}
   0xb   :  { %s916_s26 = scalar_lea.vmem %s31_s16, 1024  ;;  %p921_p4 = scmp.lt.s32.totalorder %s31_s16, %s31_s16 }
   0xc   :  { %p917_p3 = scmp.ne.s32.totalorder %s31_s16, %s916_s26  ;;  %p922_p5 = scmp.lt.s32.totalorder %s916_s26, %s916_s26 }
   0xe   :  { %p923_p6 = por %p922_p5, %p921_p4 }
  0x10   :  { %p924_p7 = pnand %p923_p6, %p917_p3 }
  0x12   :  { %927 = shalt.err (!%p924_p7)
}
  0x13   :  { %s1026_s27 = smov 64   ;;  %s1027_s28 = smov 4  }
  0x14   :  { %36 = dma.hbm_to_vmem [thread:$0]  %s1136_s1, 1024, %s31_s16, [#allocation7], %s1026_s27, %s1026_s27, %s1027_s28  }
  0x15   :  { %s928_s7 = scalar_lea.hbm %s1135_s0, 1024 }
  0x16   :  { %p929_p8 = scmp.ne.s32.totalorder %s1135_s0, %s928_s7  ;;  %p932_p9 = scmp.lt.u32.totalorder %s928_s7, %s1135_s0 }
  0x18   :  { %p934_p10 = pnand %p932_p9, %p929_p8 }
  0x1a   :  { %937 = shalt.err (!%p934_p10)
}
  0x1b   :  { %s938_s12 = scalar_lea.vmem %s1056_s18, 1024  ;;  %p943_p12 = scmp.lt.s32.totalorder %s1056_s18, %s1056_s18 }
  0x1c   :  { %p939_p11 = scmp.ne.s32.totalorder %s1056_s18, %s938_s12  ;;  %p944_p13 = scmp.lt.s32.totalorder %s938_s12, %s938_s12 }
  0x1e   :  { %p945_p0 = por %p944_p13, %p943_p12 }
  0x20   :  { %p946_p1 = pnand %p945_p0, %p939_p11 }
  0x22   :  { %949 = shalt.err (!%p946_p1)
}
  0x23   :  { %24 = dma.hbm_to_vmem [thread:$0]  %s1135_s0, 1024, %s1056_s18, [#allocation4], %s1026_s27, %s1026_s27, %s1027_s28  }
  0x24   :  { %s1028_s14 = smov [#allocation8]   ;;  %s1029_s16 = smov [#allocation9]  }
  0x25   :  { %s42_s15 = sshll.u32 %s1028_s14, 4  ;;  %s55_s17 = sshll.u32 %s1029_s16, 4  ;;  %s43_s15 = int_to_ptr.vmem [resolvable:$true] %s42_s15  ;;  %s56_s17 = int_to_ptr.vmem [resolvable:$true] %s55_s17 }
  0x26   :  { %s950_s21 = scalar_lea.hbm %s1137_s2, 1024 }
  0x27   :  { %p951_p2 = scmp.ne.s32.totalorder %s1137_s2, %s950_s21  ;;  %p954_p3 = scmp.lt.u32.totalorder %s950_s21, %s1137_s2 }
  0x29   :  { %p956_p4 = pnand %p954_p3, %p951_p2 }
  0x2b   :  { %959 = shalt.err (!%p956_p4)
}
  0x2c   :  { %s960_s0 = scalar_lea.vmem %s43_s15, 1024  ;;  %p965_p6 = scmp.lt.s32.totalorder %s43_s15, %s43_s15 }
  0x2d   :  { %p961_p5 = scmp.ne.s32.totalorder %s43_s15, %s960_s0  ;;  %p966_p7 = scmp.lt.s32.totalorder %s960_s0, %s960_s0 }
  0x2f   :  { %p967_p8 = por %p966_p7, %p965_p6 }
  0x31   :  { %p968_p9 = pnand %p967_p8, %p961_p5 }
  0x33   :  { %971 = shalt.err (!%p968_p9)
}
  0x34   :  { %48 = dma.hbm_to_vmem [thread:$0]  %s1137_s2, 1024, %s43_s15, [#allocation7], %s1026_s27, %s1026_s27, %s1027_s28  }
  0x35   :  { %s972_s5 = scalar_lea.hbm %s1138_s3, 16 }
  0x36   :  { %p973_p10 = scmp.ne.s32.totalorder %s1138_s3, %s972_s5  ;;  %p976_p11 = scmp.lt.u32.totalorder %s972_s5, %s1138_s3 }
  0x38   :  { %p978_p12 = pnand %p976_p11, %p973_p10 }
  0x3a   :  { %981 = shalt.err (!%p978_p12)
}
  0x3b   :  { %s982_s10 = scalar_lea.vmem %s56_s17, 16  ;;  %s986_s11 = scalar_lea.vmem %s56_s17, 32 }
  0x3c   :  { %p983_p13 = scmp.ne.s32.totalorder %s56_s17, %s982_s10  ;;  %p987_p0 = scmp.lt.s32.totalorder %s56_s17, %s56_s17 }
  0x3d   :  { %p988_p1 = scmp.lt.s32.totalorder %s986_s11, %s982_s10 }
  0x3f   :  { %p989_p2 = por %p988_p1, %p987_p0 }
  0x41   :  { %p990_p3 = pnand %p989_p2, %p983_p13 }
  0x43   :  { %993 = shalt.err (!%p990_p3)
}
  0x44   :  { %58 = dma.hbm_to_vmem [thread:$0]  %s1138_s3, 16, %s56_s17, [#allocation10]  }
  0x45   :  { %1016 = dma.done.wait [#allocation4], 1024  }
  0x46   :  { %1017 = vsyncadd [#allocation4], 4294966272 }
  0x47   :  { %1018 = dma.done.wait [#allocation7], 2048  }
  0x48   :  { %1019 = vsyncadd [#allocation7], 4294965248 }
  0x49   :  { %1020 = dma.done.wait [#allocation10], 16  }
  0x4a   :  { %1021 = vsyncadd [#allocation10], 4294967280  ;;  %v882_v0 = vld [vmem:[#allocation6] sm:$0xff]   ;;  %v883_v1 = vld [vmem:[#allocation6 + $0x8] sm:$0xff]   ;;  %s1030_s3 = smov [#allocation11]  }
  0x4b   :  { %811 = vmatprep.subr.bf16.mxu0 %v882_v0  ;;  %v884_v2 = vld [vmem:[#allocation6 + $0x10] sm:$0xff]   ;;  %v885_v3 = vld [vmem:[#allocation6 + $0x18] sm:$0xff]   ;;  %v890_v4 = vld [vmem:[#allocation3] sm:$0xff]   ;;  %s661_s1 = sshll.u32 %s1030_s3, 4  ;;  %s662_s1 = int_to_ptr.vmem [resolvable:$true] %s661_s1 }
  0x4c   :  { %812 = vmatpush3.bf16.msra.mxu0 %v882_v0  ;;  %827 = vmatprep.mubr.bf16.mxu0 %v890_v4  ;;  %v886_v5 = vld [vmem:[#allocation6 + $0x20] sm:$0xff]   ;;  %v887_v6 = vld [vmem:[#allocation6 + $0x28] sm:$0xff]   ;;  %v888_v9 = vld [vmem:[#allocation6 + $0x30] sm:$0xff]   ;;  %s994_s13 = scalar_lea.vmem %s662_s1, 1024  ;;  %p999_p5 = scmp.lt.s32.totalorder %s662_s1, %s662_s1 }
  0x4d   :  { %813 = vmatprep.subr.bf16.mxu0 %v883_v1  ;;  %v898_v7 = vld [vmem:[#allocation8] sm:$0xff]   ;;  %v899_v8 = vld [vmem:[#allocation8 + $0x8] sm:$0xff]   ;;  %v900_v10 = vld [vmem:[#allocation8 + $0x10] sm:$0xff]   ;;  %p995_p4 = scmp.ne.s32.totalorder %s662_s1, %s994_s13  ;;  %p1000_p6 = scmp.lt.s32.totalorder %s994_s13, %s994_s13 }
  0x4e   :  { %843 = vmatprep.subr.bf16.mxu1 %v898_v7  ;;  %v889_v11 = vld [vmem:[#allocation6 + $0x38] sm:$0xff]   ;;  %v902_v13 = vld [vmem:[#allocation8 + $0x20] sm:$0xff]   ;;  %v891_v14 = vld [vmem:[#allocation3 + $0x8] sm:$0xff]  }
  0x4f   :  { %844 = vmatpush3.bf16.msra.mxu1 %v898_v7  ;;  %v901_v12 = vld [vmem:[#allocation8 + $0x18] sm:$0xff]   ;;  %v892_v15 = vld [vmem:[#allocation3 + $0x10] sm:$0xff]   ;;  %v903_v16 = vld [vmem:[#allocation8 + $0x28] sm:$0xff]   ;;  %p1001_p7 = por %p1000_p6, %p999_p5 }
  0x50   :  { %814 = vmatpush3.bf16.msra.mxu0 %v883_v1  ;;  %845 = vmatprep.subr.bf16.mxu1 %v899_v8  ;;  %v904_v17 = vld [vmem:[#allocation8 + $0x30] sm:$0xff]   ;;  %v893_v18 = vld [vmem:[#allocation3 + $0x18] sm:$0xff]   ;;  %v894_v19 = vld [vmem:[#allocation3 + $0x20] sm:$0xff]  }
  0x51   :  { %815 = vmatprep.subr.bf16.mxu0 %v884_v2  ;;  %v895_v20 = vld [vmem:[#allocation3 + $0x28] sm:$0xff]   ;;  %v896_v21 = vld [vmem:[#allocation3 + $0x30] sm:$0xff]   ;;  %v897_v22 = vld [vmem:[#allocation3 + $0x38] sm:$0xff]   ;;  %p1002_p8 = pnand %p1001_p7, %p995_p4 }
  0x52   :  { %v905_v23 = vld [vmem:[#allocation8 + $0x38] sm:$0xff]   ;;  %v691_v48 = vld [vmem:[#allocation9] ss:$0 sm:$0xff] }
  0x53   :  { %846 = vmatpush3.bf16.msra.mxu1 %v899_v8 }
  0x54   :  { %816 = vmatpush3.bf16.msra.mxu0 %v884_v2  ;;  %847 = vmatprep.subr.bf16.mxu1 %v900_v10 }
  0x55   :  { %817 = vmatprep.subr.bf16.mxu0 %v885_v3 }
  0x57   :  { %848 = vmatpush3.bf16.msra.mxu1 %v900_v10 }
  0x58   :  { %818 = vmatpush3.bf16.msra.mxu0 %v885_v3  ;;  %849 = vmatprep.subr.bf16.mxu1 %v901_v12 }
  0x59   :  { %819 = vmatprep.subr.bf16.mxu0 %v886_v5 }
  0x5b   :  { %850 = vmatpush3.bf16.msra.mxu1 %v901_v12 }
  0x5c   :  { %820 = vmatpush3.bf16.msra.mxu0 %v886_v5  ;;  %851 = vmatprep.subr.bf16.mxu1 %v902_v13 }
  0x5d   :  { %821 = vmatprep.subr.bf16.mxu0 %v887_v6 }
  0x5f   :  { %852 = vmatpush3.bf16.msra.mxu1 %v902_v13 }
  0x60   :  { %822 = vmatpush3.bf16.msra.mxu0 %v887_v6  ;;  %853 = vmatprep.subr.bf16.mxu1 %v903_v16 }
  0x61   :  { %823 = vmatprep.subr.bf16.mxu0 %v888_v9 }
  0x63   :  { %854 = vmatpush3.bf16.msra.mxu1 %v903_v16 }
  0x64   :  { %824 = vmatpush3.bf16.msra.mxu0 %v888_v9  ;;  %855 = vmatprep.subr.bf16.mxu1 %v904_v17 }
  0x65   :  { %825 = vmatprep.subr.bf16.mxu0 %v889_v11 }
  0x67   :  { %856 = vmatpush3.bf16.msra.mxu1 %v904_v17 }
  0x68   :  { %826 = vmatpush3.bf16.msra.mxu0 %v889_v11  ;;  %857 = vmatprep.subr.bf16.mxu1 %v905_v23 }
  0x6b   :  { %828 = vmatmul.mubr.bf16.vlgmr.msra.gmra.mrb[0].mxu0 %v891_v14  ;;  %858 = vmatpush3.bf16.msra.mxu1 %v905_v23 }
  0x6c   :  { %831 = vmatprep.mubr.bf16.mxu0 %v892_v15 }
  0x73   :  { %832 = vmatmul.mubr.bf16.gmra.mrb[4].mxu0 %v893_v18 }
  0x74   :  { %835 = vmatprep.mubr.bf16.mxu0 %v894_v19 }
  0x7b   :  { %836 = vmatmul.mubr.bf16.gmra.mrb[8].mxu0 %v895_v20 }
  0x7c   :  { %839 = vmatprep.mubr.bf16.mxu0 %v896_v21 }
  0x83   :  { %840 = vmatmul.mubr.bf16.gmra.mrb[12].mxu0 %v897_v22 }
 0x13e   :  { %v829_v24 = vpop.f32.mrb[0].mxu0 }
 0x13f   :  { %v270_v25 = vpop.f32.mrb[1].mxu0 }
 0x140   :  { %v830_v26 = vpop.f32.mrb[2].mxu0 }
 0x141   :  { %v385_v27 = vpack.c.bf16 %v830_v26, %v829_v24  ;;  %v273_v28 = vpop.f32.mrb[3].mxu0 }
 0x142   :  { %v384_v29 = vpack.c.bf16 %v273_v28, %v270_v25 }
 0x144   :  { %859 = vmatprep.mubr.bf16.mxu1 %v384_v29 }
 0x145   :  { %860 = vmatmul.mubr.bf16.vlgmr.msra.gmra.mrb[0].mxu1 %v385_v27 }
 0x146   :  { %v833_v30 = vpop.f32.mrb[4].mxu0 }
 0x147   :  { %v286_v31 = vpop.f32.mrb[5].mxu0 }
 0x148   :  { %v834_v32 = vpop.f32.mrb[6].mxu0 }
 0x149   :  { %v387_v33 = vpack.c.bf16 %v834_v32, %v833_v30  ;;  %v289_v34 = vpop.f32.mrb[7].mxu0 }
 0x14a   :  { %v386_v35 = vpack.c.bf16 %v289_v34, %v286_v31 }
 0x14c   :  { %863 = vmatprep.mubr.bf16.mxu1 %v386_v35 }
 0x14d   :  { %864 = vmatmul.mubr.bf16.gmra.mrb[4].mxu1 %v387_v33 }
 0x14e   :  { %v837_v36 = vpop.f32.mrb[8].mxu0 }
 0x14f   :  { %v302_v37 = vpop.f32.mrb[9].mxu0 }
 0x150   :  { %v838_v38 = vpop.f32.mrb[10].mxu0 }
 0x151   :  { %v389_v39 = vpack.c.bf16 %v838_v38, %v837_v36  ;;  %v305_v40 = vpop.f32.mrb[11].mxu0 }
 0x152   :  { %v388_v41 = vpack.c.bf16 %v305_v40, %v302_v37 }
 0x154   :  { %867 = vmatprep.mubr.bf16.mxu1 %v388_v41 }
 0x155   :  { %868 = vmatmul.mubr.bf16.gmra.mrb[8].mxu1 %v389_v39 }
 0x156   :  { %v841_v42 = vpop.f32.mrb[12].mxu0 }
 0x157   :  { %v318_v43 = vpop.f32.mrb[13].mxu0 }
 0x158   :  { %v842_v44 = vpop.f32.mrb[14].mxu0 }
 0x159   :  { %v391_v45 = vpack.c.bf16 %v842_v44, %v841_v42  ;;  %v321_v46 = vpop.f32.mrb[15].mxu0 }
 0x15a   :  { %v390_v47 = vpack.c.bf16 %v321_v46, %v318_v43 }
 0x15c   :  { %871 = vmatprep.mubr.bf16.mxu1 %v390_v47 }
 0x15d   :  { %872 = vmatmul.mubr.bf16.gmra.mrb[12].mxu1 %v391_v45 }
 0x218   :  { %v861_v49 = vpop.f32.mrb[0].mxu1 }
 0x219   :  { %v506_v50 = vadd.f32 %v861_v49, %v691_v48  ;;  %v497_v51 = vpop.f32.mrb[1].mxu1 }
 0x21a   :  { %v498_v52 = vadd.f32 %v691_v48, %v497_v51  ;;  %v862_v53 = vpop.f32.mrb[2].mxu1 }
 0x21b   :  { %v509_v54 = vadd.f32 %v862_v53, %v691_v48  ;;  %v500_v55 = vpop.f32.mrb[3].mxu1  ;;  %v562_v57 = vmax.f32 %v506_v50, 0.0 }
 0x21c   :  { %v501_v56 = vadd.f32 %v691_v48, %v500_v55  ;;  %v560_v59 = vmax.f32 %v498_v52, 0.0 }
 0x21d   :  { %v563_v58 = vmax.f32 %v509_v54, 0.0 }
 0x21e   :  { %v561_v60 = vmax.f32 %v501_v56, 0.0 }
 0x21f   :  { %v740_v61 = vpack.c.bf16 %v563_v58, %v562_v57 }
 0x220   :  { %v735_v62 = vpack.c.bf16 %v561_v60, %v560_v59  ;;  %v865_v63 = vpop.f32.mrb[4].mxu1 }
 0x221   :  { %772 = vst [vmem:[#allocation11 + $0x8] sm:$0xff] %v740_v61   ;;  %v522_v0 = vadd.f32 %v865_v63, %v691_v48  ;;  %v513_v1 = vpop.f32.mrb[5].mxu1 }
 0x222   :  { %736 = vst [vmem:[#allocation11] sm:$0xff] %v735_v62   ;;  %v514_v2 = vadd.f32 %v691_v48, %v513_v1  ;;  %v866_v3 = vpop.f32.mrb[6].mxu1 }
 0x223   :  { %v525_v4 = vadd.f32 %v866_v3, %v691_v48  ;;  %v516_v5 = vpop.f32.mrb[7].mxu1  ;;  %v566_v7 = vmax.f32 %v522_v0, 0.0 }
 0x224   :  { %v517_v6 = vadd.f32 %v691_v48, %v516_v5  ;;  %v564_v9 = vmax.f32 %v514_v2, 0.0 }
 0x225   :  { %v567_v8 = vmax.f32 %v525_v4, 0.0 }
 0x226   :  { %v565_v10 = vmax.f32 %v517_v6, 0.0 }
 0x227   :  { %v750_v11 = vpack.c.bf16 %v567_v8, %v566_v7 }
 0x228   :  { %v745_v12 = vpack.c.bf16 %v565_v10, %v564_v9  ;;  %v869_v13 = vpop.f32.mrb[8].mxu1 }
 0x229   :  { %774 = vst [vmem:[#allocation11 + $0x18] sm:$0xff] %v750_v11   ;;  %v538_v14 = vadd.f32 %v869_v13, %v691_v48  ;;  %v529_v15 = vpop.f32.mrb[9].mxu1 }
 0x22a   :  { %773 = vst [vmem:[#allocation11 + $0x10] sm:$0xff] %v745_v12   ;;  %v530_v16 = vadd.f32 %v691_v48, %v529_v15  ;;  %v870_v17 = vpop.f32.mrb[10].mxu1 }
 0x22b   :  { %v541_v18 = vadd.f32 %v870_v17, %v691_v48  ;;  %v532_v19 = vpop.f32.mrb[11].mxu1  ;;  %v570_v21 = vmax.f32 %v538_v14, 0.0 }
 0x22c   :  { %v533_v20 = vadd.f32 %v691_v48, %v532_v19  ;;  %v568_v23 = vmax.f32 %v530_v16, 0.0 }
 0x22d   :  { %v571_v22 = vmax.f32 %v541_v18, 0.0 }
 0x22e   :  { %v569_v24 = vmax.f32 %v533_v20, 0.0 }
 0x22f   :  { %v760_v25 = vpack.c.bf16 %v571_v22, %v570_v21 }
 0x230   :  { %v755_v26 = vpack.c.bf16 %v569_v24, %v568_v23  ;;  %v873_v27 = vpop.f32.mrb[12].mxu1 }
 0x231   :  { %776 = vst [vmem:[#allocation11 + $0x28] sm:$0xff] %v760_v25   ;;  %v554_v28 = vadd.f32 %v873_v27, %v691_v48  ;;  %v545_v29 = vpop.f32.mrb[13].mxu1 }
 0x232   :  { %775 = vst [vmem:[#allocation11 + $0x20] sm:$0xff] %v755_v26   ;;  %v546_v30 = vadd.f32 %v691_v48, %v545_v29  ;;  %v874_v31 = vpop.f32.mrb[14].mxu1 }
 0x233   :  { %v557_v32 = vadd.f32 %v874_v31, %v691_v48  ;;  %v548_v33 = vpop.f32.mrb[15].mxu1  ;;  %v574_v35 = vmax.f32 %v554_v28, 0.0 }
 0x234   :  { %v549_v34 = vadd.f32 %v691_v48, %v548_v33  ;;  %v572_v37 = vmax.f32 %v546_v30, 0.0 }
 0x235   :  { %v575_v36 = vmax.f32 %v557_v32, 0.0 }
 0x236   :  { %v573_v38 = vmax.f32 %v549_v34, 0.0 }
 0x237   :  { %v770_v39 = vpack.c.bf16 %v575_v36, %v574_v35 }
 0x238   :  { %v765_v40 = vpack.c.bf16 %v573_v38, %v572_v37 }
 0x239   :  { %778 = vst [vmem:[#allocation11 + $0x38] sm:$0xff] %v770_v39  }
 0x23a   :  { %777 = vst [vmem:[#allocation11 + $0x30] sm:$0xff] %v765_v40  }
 0x23b   :  { %1005 = shalt.err (!%p1002_p8)
}
 0x23c   :  { %s1006_s16 = scalar_lea.hbm %s1139_s4, 1024 }
 0x23d   :  { %p1007_p9 = scmp.ne.s32.totalorder %s1139_s4, %s1006_s16  ;;  %p1010_p10 = scmp.lt.u32.totalorder %s1006_s16, %s1139_s4 }
 0x23f   :  { %p1012_p11 = pnand %p1010_p10, %p1007_p9 }
 0x241   :  { %1015 = shalt.err (!%p1012_p11)
}
 0x242   :  { %667 = dma.vmem_to_hbm [thread:$0]  %s662_s1, 1024, %s1139_s4, [#allocation5], %s1026_s27, %s1026_s27, %s1027_s28  }
 0x243   :  { %1022 = dma.done.wait [#allocation5], 1024  }
 0x244   :  { %1023 = vsyncadd [#allocation5], 4294966272 }
 0x245   :  { %671 = vsyncpa [#allocation4], 1 }
 0x246   :  { %672 = vsyncpa [#allocation7], 1 }
 0x247   :  { %673 = vsyncpa [#allocation10], 1 }
 0x248   :  { %674 = vsyncpa [#allocation5], 1 }

</bundles_post_ra>
